<compile_context>
chip_gen: v7x
topology: tpu7x:2x2x1
jax: 0.10.0
libtpu: 0.0.40
codegen_flags: <defaults>
</compile_context>

<pallas_src>
import functools

import jax
import jax.numpy as jnp
from jax.experimental import pallas as pl
from jax.experimental.pallas import tpu as pltpu


def _round_up(n, m):
    return ((n + m - 1) // m) * m


def _mlp_kernel(n_layers, compute_dtype, *refs):
    """Fused MLP forward. refs = (x_ref, w0, b0, w1, b1, ..., o_ref)."""
    x_ref = refs[0]
    o_ref = refs[-1]
    params = refs[1:-1]

    h = x_ref[...]  # (bm, fold*in_dim) in compute_dtype (bf16 or f32)
    for i in range(n_layers):
        w_ref = params[2 * i]
        b_ref = params[2 * i + 1]
        # MXU matmul with f32 accumulation; bias add + ReLU on the f32 accumulator.
        acc = jnp.dot(h, w_ref[...], preferred_element_type=jnp.float32)
        acc = acc + b_ref[...]
        if i < n_layers - 1:
            acc = jnp.maximum(acc, 0.0)        # hidden activation = ReLU
            h = acc.astype(compute_dtype)      # back to MXU-native dtype
        else:
            h = acc                            # out_activation = Identity
    o_ref[...] = h.astype(o_ref.dtype)


def prepare_mlp_params(weights, biases, *, use_bf16=True, fold=None):
    """One-time parameter prep (hoisted out of the per-call hot path).

    Casts to the MXU compute dtype and, when in_dim < 128, builds block-diagonal
    weights kron(I_fold, W) so `fold` batch rows can be folded into the lane dim.
    Returns (ws, bs, fold).
    """
    assert len(weights) == len(biases)
    in_dim = weights[0].shape[0]
    compute_dtype = jnp.bfloat16 if use_bf16 else jnp.float32
    if fold is None:
        fold = max(1, min(8, 128 // in_dim)) if in_dim < 128 else 1
    ws, bs = [], []
    for w, b in zip(weights, biases):
        w32 = w.astype(jnp.float32)
        b32 = b.astype(jnp.float32).reshape(1, -1)
        if fold > 1:
            w32 = jnp.kron(jnp.eye(fold, dtype=jnp.float32), w32)  # block-diagonal
            b32 = jnp.tile(b32, (1, fold))
        ws.append(w32.astype(compute_dtype))
        bs.append(b32)  # biases kept in f32 (added to the f32 accumulator)
    return ws, bs, fold


@functools.partial(jax.jit, static_argnames=("fold", "block_batch", "core_parallel"))
def mlp_pallas(x, ws, bs, *, fold=1, block_batch=1024, core_parallel=False):
    """Run the fused MLP Pallas kernel.

    x:  (B, in_dim)
    ws: list of (fold*d_in_i, fold*d_out_i) arrays from prepare_mlp_params
    bs: list of (1, fold*d_out_i) f32 arrays from prepare_mlp_params
    """
    assert len(ws) == len(bs)
    n_layers = len(ws)
    B, in_dim = x.shape
    compute_dtype = ws[0].dtype
    out_dtype = x.dtype
    fold_in = fold * in_dim
    fold_out = ws[-1].shape[1]
    out_dim = fold_out // fold
    assert ws[0].shape[0] == fold_in

    # Fold batch rows into lanes; pad so every tile is sublane-aligned.
    sub = 16 if compute_dtype == jnp.bfloat16 else 8
    Bf = pl.cdiv(B, fold)
    Bf_pad = _round_up(max(Bf, sub), sub)

    x_c = x.astype(compute_dtype)
    pad_rows = Bf_pad * fold - B
    if pad_rows:
        x_c = jnp.pad(x_c, ((0, pad_rows), (0, 0)))
    x_f = x_c.reshape(Bf_pad, fold_in)

    # Batch tile: large (512-1024 folded rows) to amortize the ~0.35us/step overhead and
    # hit the mem-bound roofline; multiple of the sublane pack. cdiv leaves at most one
    # (sublane-aligned) partial tile.
    bm = min(block_batch, Bf_pad)
    bm = max(sub, (bm // sub) * sub)
    grid = (pl.cdiv(Bf_pad, bm),)

    in_specs = [pl.BlockSpec((bm, fold_in), lambda i: (i, 0))]
    for w, b in zip(ws, bs):
        # Params are small; constant index map -> fetched once, kept resident across steps.
        in_specs.append(pl.BlockSpec(w.shape, lambda i: (0, 0)))
        in_specs.append(pl.BlockSpec(b.shape, lambda i: (0, 0)))
    # Output block last dim == full (folded) out_dim: no zero-padded writeback columns.
    out_spec = pl.BlockSpec((bm, fold_out), lambda i: (i, 0))

    # Explicit VMEM budget with a chip-derived ceiling (v7x has only 64 MiB per TC).
    xb = jnp.dtype(compute_dtype).itemsize
    ob = jnp.dtype(out_dtype).itemsize
    param_bytes = sum(int(w.size) * xb + int(b.size) * 4 for w, b in zip(ws, bs))
    vmem_need = 2 * bm * fold_in * xb + 2 * bm * fold_out * ob + 2 * param_bytes
    try:
        vmem_cap = int(getattr(pltpu.get_tpu_info(), "vmem_capacity_bytes", 64 << 20))
    except Exception:  # conservative fallback if the query is unavailable
        vmem_cap = 64 << 20
    vmem_ceiling = max(16 << 20, vmem_cap - (12 << 20))
    vmem_limit = int(min(max(vmem_need + (4 << 20), 16 << 20), vmem_ceiling))

    # Advisory cost estimate: this kernel is bytes-moved bound, not FLOP bound.
    flops = 2 * Bf_pad * sum(int(w.shape[0]) * int(w.shape[1]) for w in ws)
    bytes_accessed = Bf_pad * fold_in * xb + Bf_pad * fold_out * ob + param_bytes
    cost = pl.CostEstimate(flops=flops, transcendentals=0, bytes_accessed=bytes_accessed)

    # Plain "parallel" by default; opt into CORE_PARALLEL on v7x (2 TC/chip).
    batch_sem = pltpu.CORE_PARALLEL if core_parallel else "parallel"

    kernel = functools.partial(_mlp_kernel, n_layers, compute_dtype)

    out_f = pl.pallas_call(
        kernel,
        out_shape=jax.ShapeDtypeStruct((Bf_pad, fold_out), out_dtype),
        grid_spec=pltpu.PrefetchScalarGridSpec(
            num_scalar_prefetch=0,
            grid=grid,
            in_specs=in_specs,
            out_specs=out_spec,
        ),
        compiler_params=pltpu.CompilerParams(
            dimension_semantics=(batch_sem,),
            vmem_limit_bytes=vmem_limit,
        ),
        cost_estimate=cost,
    )(x_f, *[p for wb in zip(ws, bs) for p in wb])

    out = out_f.reshape(Bf_pad * fold, out_dim)
    return out[:B] if Bf_pad * fold != B else out


def init_mlp_params(key, in_dim, hidden_dims, out_dim):
    """Deterministic xavier_uniform weights, zero biases (matches Mlp._init_weights)."""
    dims = [in_dim] + list(hidden_dims) + [out_dim]
    weights, biases = [], []
    for i in range(len(dims) - 1):
        key, sub = jax.random.split(key)
        fan_in, fan_out = dims[i], dims[i + 1]
        bound = (6.0 / (fan_in + fan_out)) ** 0.5
        w = jax.random.uniform(sub, (fan_in, fan_out), jnp.float32, -bound, bound)
        b = jnp.zeros((1, fan_out), jnp.float32)
        weights.append(w)
        biases.append(b)
    return weights, biases


def mlp_reference(x, weights, biases, *, use_bf16=True):
    """Pure-JAX reference with the same dtype policy as the kernel (unfolded)."""
    compute_dtype = jnp.bfloat16 if use_bf16 else jnp.float32
    h = x.astype(compute_dtype)
    for i, (w, b) in enumerate(zip(weights, biases)):
        acc = jnp.dot(h, w.astype(compute_dtype), preferred_element_type=jnp.float32)
        acc = acc + b.astype(jnp.float32).reshape(1, -1)
        if i < len(weights) - 1:
            acc = jnp.maximum(acc, 0.0)
            h = acc.astype(compute_dtype)
        else:
            h = acc
    return h.astype(x.dtype)


if __name__ == "__main__":
    key = jax.random.PRNGKey(0)
    in_dim, hidden_dims, out_dim = 16, [32, 32], 8
    batch = 200

    k_x, k_p = jax.random.split(key)
    x = jax.random.normal(k_x, (batch, in_dim), jnp.float32)
    weights, biases = init_mlp_params(k_p, in_dim, hidden_dims, out_dim)

    # 1) Default bf16 MXU path with lane-dense batch folding (fold=8 -> 128-lane input).
    ws, bs, fold = prepare_mlp_params(weights, biases, use_bf16=True)
    out_bf16 = jax.block_until_ready(mlp_pallas(x, ws, bs, fold=fold))
    ref_bf16 = mlp_reference(x, weights, biases, use_bf16=True)
    assert out_bf16.shape == (batch, out_dim)
    assert jnp.allclose(out_bf16, ref_bf16, atol=2e-3, rtol=2e-3), (
        f"bf16 folded mismatch: max err {jnp.max(jnp.abs(out_bf16 - ref_bf16))}"
    )

    # 2) Unfolded, multi-step grid path (exercises pipelining + aligned partial last tile).
    ws1, bs1, _ = prepare_mlp_params(weights, biases, use_bf16=True, fold=1)
    out_ms = jax.block_until_ready(mlp_pallas(x, ws1, bs1, fold=1, block_batch=64))
    assert out_ms.shape == (batch, out_dim)
    assert jnp.allclose(out_ms, ref_bf16, atol=2e-3, rtol=2e-3), (
        f"bf16 multi-step mismatch: max err {jnp.max(jnp.abs(out_ms - ref_bf16))}"
    )

    # 3) f32 path sanity check (exact math vs pure-JAX f32 reference).
    wsf, bsf, foldf = prepare_mlp_params(weights, biases, use_bf16=False)
    out_f32 = jax.block_until_ready(mlp_pallas(x, wsf, bsf, fold=foldf))
    ref_f32 = mlp_reference(x, weights, biases, use_bf16=False)
    assert out_f32.shape == (batch, out_dim)
    assert jnp.allclose(out_f32, ref_f32, atol=1e-5, rtol=1e-5), (
        f"f32 mismatch: max err {jnp.max(jnp.abs(out_f32 - ref_f32))}"
    )

    print("KERNEL_OK")
</pallas_src>

<mosaic_0001>
module attributes {stable_mosaic.version = 11 : i64} {
  func.func @_mlp_kernel(%arg0: i32, %arg1: memref<32x128xbf16, #tpu.memory_space<vmem>>, %arg2: memref<128x256xbf16, #tpu.memory_space<vmem>>, %arg3: memref<1x256xf32, #tpu.memory_space<vmem>>, %arg4: memref<256x256xbf16, #tpu.memory_space<vmem>>, %arg5: memref<1x256xf32, #tpu.memory_space<vmem>>, %arg6: memref<256x64xbf16, #tpu.memory_space<vmem>>, %arg7: memref<1x64xf32, #tpu.memory_space<vmem>>, %arg8: memref<32x64xf32, #tpu.memory_space<vmem>>) attributes {dimension_semantics = [#tpu.dimension_semantics<parallel>], iteration_bounds = array<i64: 1>, scalar_prefetch = 0 : i64, scratch_operands = 0 : i64, tpu.core_type = #tpu.core_type<tc>, window_params = [{transform_indices = @transform_0, window_bounds = array<i64: 32, 128>}, {pipeline_mode = #tpu.pipeline_mode<synchronous>, transform_indices = @transform_1, window_bounds = array<i64: 128, 256>}, {pipeline_mode = #tpu.pipeline_mode<synchronous>, transform_indices = @transform_2, window_bounds = array<i64: 1, 256>}, {pipeline_mode = #tpu.pipeline_mode<synchronous>, transform_indices = @transform_3, window_bounds = array<i64: 256, 256>}, {pipeline_mode = #tpu.pipeline_mode<synchronous>, transform_indices = @transform_4, window_bounds = array<i64: 1, 256>}, {pipeline_mode = #tpu.pipeline_mode<synchronous>, transform_indices = @transform_5, window_bounds = array<i64: 256, 64>}, {pipeline_mode = #tpu.pipeline_mode<synchronous>, transform_indices = @transform_6, window_bounds = array<i64: 1, 64>}, {transform_indices = @transform_7, window_bounds = array<i64: 32, 64>}]} {
    %c0 = arith.constant 0 : index
    %c0_0 = arith.constant 0 : index
    %0 = vector.load %arg1[%c0, %c0_0] : memref<32x128xbf16, #tpu.memory_space<vmem>>, vector<32x128xbf16>
    %c0_1 = arith.constant 0 : index
    %c0_2 = arith.constant 0 : index
    %1 = vector.load %arg2[%c0_1, %c0_2] : memref<128x256xbf16, #tpu.memory_space<vmem>>, vector<128x256xbf16>
    %cst = arith.constant dense<0.000000e+00> : vector<32x256xf32>
    %2 = tpu.matmul %0, %1, %cst {dimension_numbers = #tpu.dot_dimension_numbers<[1], [0], [0], [1], [0, 0, 1, 1], [], []>} : vector<32x128xbf16>, vector<128x256xbf16>, vector<32x256xf32> -> vector<32x256xf32>
    %c0_3 = arith.constant 0 : index
    %c0_4 = arith.constant 0 : index
    %3 = vector.load %arg3[%c0_3, %c0_4] : memref<1x256xf32, #tpu.memory_space<vmem>>, vector<1x256xf32>
    %4 = vector.broadcast %3 : vector<1x256xf32> to vector<32x256xf32>
    %5 = arith.addf %2, %4 : vector<32x256xf32>
    %cst_5 = arith.constant 0.000000e+00 : f32
    %6 = vector.broadcast %cst_5 : f32 to vector<32x256xf32>
    %7 = arith.maximumf %5, %6 : vector<32x256xf32>
    %8 = arith.truncf %7 : vector<32x256xf32> to vector<32x256xbf16>
    %c0_6 = arith.constant 0 : index
    %c0_7 = arith.constant 0 : index
    %9 = vector.load %arg4[%c0_6, %c0_7] : memref<256x256xbf16, #tpu.memory_space<vmem>>, vector<256x256xbf16>
    %cst_8 = arith.constant dense<0.000000e+00> : vector<32x256xf32>
    %10 = tpu.matmul %8, %9, %cst_8 {dimension_numbers = #tpu.dot_dimension_numbers<[1], [0], [0], [1], [0, 0, 1, 1], [], []>} : vector<32x256xbf16>, vector<256x256xbf16>, vector<32x256xf32> -> vector<32x256xf32>
    %c0_9 = arith.constant 0 : index
    %c0_10 = arith.constant 0 : index
    %11 = vector.load %arg5[%c0_9, %c0_10] : memref<1x256xf32, #tpu.memory_space<vmem>>, vector<1x256xf32>
    %12 = vector.broadcast %11 : vector<1x256xf32> to vector<32x256xf32>
    %13 = arith.addf %10, %12 : vector<32x256xf32>
    %cst_11 = arith.constant 0.000000e+00 : f32
    %14 = vector.broadcast %cst_11 : f32 to vector<32x256xf32>
    %15 = arith.maximumf %13, %14 : vector<32x256xf32>
    %16 = arith.truncf %15 : vector<32x256xf32> to vector<32x256xbf16>
    %c0_12 = arith.constant 0 : index
    %c0_13 = arith.constant 0 : index
    %17 = vector.load %arg6[%c0_12, %c0_13] : memref<256x64xbf16, #tpu.memory_space<vmem>>, vector<256x64xbf16>
    %cst_14 = arith.constant dense<0.000000e+00> : vector<32x64xf32>
    %18 = tpu.matmul %16, %17, %cst_14 {dimension_numbers = #tpu.dot_dimension_numbers<[1], [0], [0], [1], [0, 0, 1, 1], [], []>} : vector<32x256xbf16>, vector<256x64xbf16>, vector<32x64xf32> -> vector<32x64xf32>
    %c0_15 = arith.constant 0 : index
    %c0_16 = arith.constant 0 : index
    %19 = vector.load %arg7[%c0_15, %c0_16] : memref<1x64xf32, #tpu.memory_space<vmem>>, vector<1x64xf32>
    %20 = vector.broadcast %19 : vector<1x64xf32> to vector<32x64xf32>
    %21 = arith.addf %18, %20 : vector<32x64xf32>
    %c0_17 = arith.constant 0 : index
    %c0_18 = arith.constant 0 : index
    %22 = vector.load %arg8[%c0_17, %c0_18] : memref<32x64xf32, #tpu.memory_space<vmem>>, vector<32x64xf32>
    tpu.vector_store %arg8[%c0_17, %c0_18], %21 {strides = array<i32>} : memref<32x64xf32, #tpu.memory_space<vmem>>, vector<32x64xf32>,
    return
  }
  func.func @transform_0(%arg0: i32) -> (i32, i32) {
    %c0_i32 = arith.constant 0 : i32
    %c0_i32_0 = arith.constant 0 : i32
    return %arg0, %c0_i32 : i32, i32
  }
  func.func @transform_1(%arg0: i32) -> (i32, i32) {
    %c0_i32 = arith.constant 0 : i32
    %c0_i32_0 = arith.constant 0 : i32
    %c0_i32_1 = arith.constant 0 : i32
    return %c0_i32, %c0_i32_0 : i32, i32
  }
  func.func @transform_2(%arg0: i32) -> (i32, i32) {
    %c0_i32 = arith.constant 0 : i32
    %c0_i32_0 = arith.constant 0 : i32
    %c0_i32_1 = arith.constant 0 : i32
    return %c0_i32, %c0_i32_0 : i32, i32
  }
  func.func @transform_3(%arg0: i32) -> (i32, i32) {
    %c0_i32 = arith.constant 0 : i32
    %c0_i32_0 = arith.constant 0 : i32
    %c0_i32_1 = arith.constant 0 : i32
    return %c0_i32, %c0_i32_0 : i32, i32
  }
  func.func @transform_4(%arg0: i32) -> (i32, i32) {
    %c0_i32 = arith.constant 0 : i32
    %c0_i32_0 = arith.constant 0 : i32
    %c0_i32_1 = arith.constant 0 : i32
    return %c0_i32, %c0_i32_0 : i32, i32
  }
  func.func @transform_5(%arg0: i32) -> (i32, i32) {
    %c0_i32 = arith.constant 0 : i32
    %c0_i32_0 = arith.constant 0 : i32
    %c0_i32_1 = arith.constant 0 : i32
    return %c0_i32, %c0_i32_0 : i32, i32
  }
  func.func @transform_6(%arg0: i32) -> (i32, i32) {
    %c0_i32 = arith.constant 0 : i32
    %c0_i32_0 = arith.constant 0 : i32
    %c0_i32_1 = arith.constant 0 : i32
    return %c0_i32, %c0_i32_0 : i32, i32
  }
  func.func @transform_7(%arg0: i32) -> (i32, i32) {
    %c0_i32 = arith.constant 0 : i32
    %c0_i32_0 = arith.constant 0 : i32
    return %arg0, %c0_i32 : i32, i32
  }
}

</mosaic_0001>

<bundles_post_ra>
// kernel: mlp_pallas.1
= control target key start
LH: loop header
LB: loop body
LE: loop exit
PB: predicated region body
PF: predicated region fallthrough
CT: control target
= control target key end

     0   :  { %v864_v1 = vmov 0   ;;  %v49_v62 = vlaneseq  ;;  %vm669_vm0 = vcmask 523264   ;;  %s1128_s1 = inlined_call_operand.vmem [shape: bf16[128,256], index: 1, kind: input, shape index: {}]   ;;  %s1129_s0 = inlined_call_operand.vmem [shape: bf16[32,128], index: 0, kind: input, shape index: {}]   ;;  %s1130_s3 = inlined_call_operand.vmem [shape: bf16[256,256], index: 3, kind: input, shape index: {}]   ;;  %s1131_s5 = inlined_call_operand.vmem [shape: bf16[256,64], index: 5, kind: input, shape index: {}]   ;;  %s1132_s2 = inlined_call_operand.vmem [shape: f32[1,256], index: 2, kind: input, shape index: {}]   ;;  %s1133_s4 = inlined_call_operand.vmem [shape: f32[1,256], index: 4, kind: input, shape index: {}]   ;;  %s1134_s6 = inlined_call_operand.vmem [shape: f32[1,64], index: 6, kind: input, shape index: {}]   ;;  %s1135_s7 = inlined_call_operand.vmem [shape: f32[32,64], index: 7, kind: output, shape index: {}]  }
   0x1   :  { %v774_v0 = vld [vmem:[%s1128_s1 + $0x4] ss:$8 sps:$4 sm:$0xff]   ;;  %183 = vmatprep.mubr.bf16.mxu0 %v864_v1  ;;  %v776_v2 = vld [vmem:[%s1128_s1] ss:$8 sps:$4 sm:$0xff]   ;;  %v777_v3 = vld [vmem:[%s1128_s1 + $0x14] ss:$8 sps:$4 sm:$0xff]  }
   0x2   :  { %151 = vmatprep.subr.bf16.mxu0 %v774_v0  ;;  %v779_v4 = vld [vmem:[%s1128_s1 + $0x10] ss:$8 sps:$4 sm:$0xff]   ;;  %v780_v5 = vld [vmem:[%s1128_s1 + $0x24] ss:$8 sps:$4 sm:$0xff]   ;;  %v782_v6 = vld [vmem:[%s1128_s1 + $0x20] ss:$8 sps:$4 sm:$0xff]  }
   0x3   :  { %152 = vmatpush1.bf16.msra.mxu0 %v776_v2  ;;  %v783_v7 = vld [vmem:[%s1128_s1 + $0x34] ss:$8 sps:$4 sm:$0xff]   ;;  %v785_v8 = vld [vmem:[%s1128_s1 + $0x30] ss:$8 sps:$4 sm:$0xff]   ;;  %v786_v9 = vld [vmem:[%s1128_s1 + $0x44] ss:$8 sps:$4 sm:$0xff]  }
   0x4   :  { %153 = vmatprep.subr.bf16.mxu0 %v777_v3  ;;  %v800_v10 = vld [vmem:[%s1130_s3 + $0x4] ss:$8 sps:$4 sm:$0xff]   ;;  %v802_v11 = vld [vmem:[%s1130_s3] ss:$8 sps:$4 sm:$0xff]   ;;  %v803_v12 = vld [vmem:[%s1130_s3 + $0x14] ss:$8 sps:$4 sm:$0xff]  }
   0x5   :  { %v788_v13 = vld [vmem:[%s1128_s1 + $0x40] ss:$8 sps:$4 sm:$0xff]   ;;  %420 = vmatprep.subr.bf16.mxu1 %v800_v10  ;;  %v789_v14 = vld [vmem:[%s1128_s1 + $0x54] ss:$8 sps:$4 sm:$0xff]   ;;  %v805_v15 = vld [vmem:[%s1130_s3 + $0x10] ss:$8 sps:$4 sm:$0xff]  }
   0x6   :  { %421 = vmatpush1.bf16.msra.mxu1 %v802_v11  ;;  %v806_v16 = vld [vmem:[%s1130_s3 + $0x24] ss:$8 sps:$4 sm:$0xff]   ;;  %v791_v17 = vld [vmem:[%s1128_s1 + $0x50] ss:$8 sps:$4 sm:$0xff]   ;;  %v808_v19 = vld [vmem:[%s1130_s3 + $0x20] ss:$8 sps:$4 sm:$0xff]  }
   0x7   :  { %154 = vmatpush1.bf16.msra.mxu0 %v779_v4  ;;  %422 = vmatprep.subr.bf16.mxu1 %v803_v12  ;;  %v792_v18 = vld [vmem:[%s1128_s1 + $0x64] ss:$8 sps:$4 sm:$0xff]   ;;  %v809_v20 = vld [vmem:[%s1130_s3 + $0x34] ss:$8 sps:$4 sm:$0xff]   ;;  %v794_v21 = vld [vmem:[%s1128_s1 + $0x60] ss:$8 sps:$4 sm:$0xff]  }
   0x8   :  { %155 = vmatprep.subr.bf16.mxu0 %v780_v5  ;;  %v795_v22 = vld [vmem:[%s1128_s1 + $0x74] ss:$8 sps:$4 sm:$0xff]   ;;  %v811_v23 = vld [vmem:[%s1130_s3 + $0x30] ss:$8 sps:$4 sm:$0xff]   ;;  %v812_v24 = vld [vmem:[%s1130_s3 + $0x44] ss:$8 sps:$4 sm:$0xff]  }
   0x9   :  { %v797_v25 = vld [vmem:[%s1128_s1 + $0x70] ss:$8 sps:$4 sm:$0xff]   ;;  %v814_v26 = vld [vmem:[%s1130_s3 + $0x40] ss:$8 sps:$4 sm:$0xff]   ;;  %v815_v27 = vld [vmem:[%s1130_s3 + $0x54] ss:$8 sps:$4 sm:$0xff]  }
   0xa   :  { %423 = vmatpush1.bf16.msra.mxu1 %v805_v15  ;;  %v798_v28 = vld [vmem:[%s1129_s0] sm:$0xff]   ;;  %v817_v29 = vld [vmem:[%s1130_s3 + $0x50] ss:$8 sps:$4 sm:$0xff]   ;;  %v821_v32 = vld [vmem:[%s1130_s3 + $0x74] ss:$8 sps:$4 sm:$0xff]   ;;  %v50_v63 = vshrl.u32 %v49_v62, 7 }
   0xb   :  { %156 = vmatpush1.bf16.msra.mxu0 %v782_v6  ;;  %424 = vmatprep.subr.bf16.mxu1 %v806_v16  ;;  %v818_v30 = vld [vmem:[%s1130_s3 + $0x64] ss:$8 sps:$4 sm:$0xff]   ;;  %v820_v31 = vld [vmem:[%s1130_s3 + $0x60] ss:$8 sps:$4 sm:$0xff]   ;;  %v823_v34 = vld [vmem:[%s1130_s3 + $0x70] ss:$8 sps:$4 sm:$0xff]  }
   0xc   :  { %157 = vmatprep.subr.bf16.mxu0 %v783_v7  ;;  %v799_v33 = vld [vmem:[%s1129_s0 + $0x8] sm:$0xff]   ;;  %v827_v37 = vld [vmem:[%s1130_s3 + $0x94] ss:$8 sps:$4 sm:$0xff]   ;;  %v829_v38 = vld [vmem:[%s1130_s3 + $0x90] ss:$8 sps:$4 sm:$0xff]   ;;  %v51_v0 = vsub.s32 0, %v50_v63 }
   0xd   :  { %v824_v35 = vld [vmem:[%s1130_s3 + $0x84] ss:$8 sps:$4 sm:$0xff]   ;;  %v826_v36 = vld [vmem:[%s1130_s3 + $0x80] ss:$8 sps:$4 sm:$0xff]   ;;  %v833_v41 = vld [vmem:[%s1130_s3 + $0xb4] ss:$8 sps:$4 sm:$0xff]  }
   0xe   :  { %425 = vmatpush1.bf16.msra.mxu1 %v808_v19  ;;  %v830_v39 = vld [vmem:[%s1130_s3 + $0xa4] ss:$8 sps:$4 sm:$0xff]   ;;  %v832_v40 = vld [vmem:[%s1130_s3 + $0xa0] ss:$8 sps:$4 sm:$0xff]   ;;  %v835_v42 = vld [vmem:[%s1130_s3 + $0xb0] ss:$8 sps:$4 sm:$0xff]  }
   0xf   :  { %158 = vmatpush1.bf16.msra.mxu0 %v785_v8  ;;  %426 = vmatprep.subr.bf16.mxu1 %v809_v20  ;;  %v836_v43 = vld [vmem:[%s1130_s3 + $0xc4] ss:$8 sps:$4 sm:$0xff]   ;;  %v838_v44 = vld [vmem:[%s1130_s3 + $0xc0] ss:$8 sps:$4 sm:$0xff]   ;;  %v839_v45 = vld [vmem:[%s1130_s3 + $0xd4] ss:$8 sps:$4 sm:$0xff]  }
  0x10   :  { %159 = vmatprep.subr.bf16.mxu0 %v786_v9  ;;  %v841_v46 = vld [vmem:[%s1130_s3 + $0xd0] ss:$8 sps:$4 sm:$0xff]   ;;  %v842_v47 = vld [vmem:[%s1130_s3 + $0xe4] ss:$8 sps:$4 sm:$0xff]   ;;  %v844_v48 = vld [vmem:[%s1130_s3 + $0xe0] ss:$8 sps:$4 sm:$0xff]  }
  0x11   :  { %v845_v49 = vld [vmem:[%s1130_s3 + $0xf4] ss:$8 sps:$4 sm:$0xff]   ;;  %v847_v50 = vld [vmem:[%s1130_s3 + $0xf0] ss:$8 sps:$4 sm:$0xff]   ;;  %v848_v51 = vld [vmem:[%s1131_s5 + $0x40] sm:$0xff]   ;;  %v55_v2 = vsub.s32 1, %v50_v63 }
  0x12   :  { %427 = vmatpush1.bf16.msra.mxu1 %v811_v23  ;;  %v849_v52 = vld [vmem:[%s1131_s5] sm:$0xff]   ;;  %v850_v53 = vld [vmem:[%s1131_s5 + $0x48] sm:$0xff]   ;;  %v852_v55 = vld [vmem:[%s1131_s5 + $0x50] sm:$0xff]  }
  0x13   :  { %160 = vmatpush1.bf16.msra.mxu0 %v788_v13  ;;  %428 = vmatprep.subr.bf16.mxu1 %v812_v24  ;;  %v851_v54 = vld [vmem:[%s1131_s5 + $0x8] sm:$0xff]   ;;  %v853_v56 = vld [vmem:[%s1131_s5 + $0x10] sm:$0xff]   ;;  %v854_v57 = vld [vmem:[%s1131_s5 + $0x58] sm:$0xff]  }
  0x14   :  { %161 = vmatprep.subr.bf16.mxu0 %v789_v14  ;;  %v855_v58 = vld [vmem:[%s1131_s5 + $0x18] sm:$0xff]   ;;  %v856_v59 = vld [vmem:[%s1131_s5 + $0x60] sm:$0xff]   ;;  %v858_v61 = vld [vmem:[%s1131_s5 + $0x68] sm:$0xff]  }
  0x15   :  { %v857_v60 = vld [vmem:[%s1131_s5 + $0x20] sm:$0xff]  }
  0x16   :  { %429 = vmatpush1.bf16.msra.mxu1 %v814_v26 }
  0x17   :  { %162 = vmatpush1.bf16.msra.mxu0 %v791_v17  ;;  %430 = vmatprep.subr.bf16.mxu1 %v815_v27 }
  0x18   :  { %163 = vmatprep.subr.bf16.mxu0 %v792_v18 }
  0x1a   :  { %431 = vmatpush1.bf16.msra.mxu1 %v817_v29 }
  0x1b   :  { %164 = vmatpush1.bf16.msra.mxu0 %v794_v21  ;;  %432 = vmatprep.subr.bf16.mxu1 %v818_v30 }
  0x1c   :  { %165 = vmatprep.subr.bf16.mxu0 %v795_v22 }
  0x1e   :  { %433 = vmatpush1.bf16.msra.mxu1 %v820_v31 }
  0x1f   :  { %166 = vmatpush1.bf16.msra.mxu0 %v797_v25  ;;  %434 = vmatprep.subr.bf16.mxu1 %v821_v32 }
  0x20   :  { %745 = vmatprep.subr.bf16.mxu0 %v848_v51 }
  0x22   :  { %184 = vmatmul.mubr.bf16.vlgmr.msra.gmra.mrb[0].mxu0 %v798_v28  ;;  %435 = vmatpush1.bf16.msra.mxu1 %v823_v34  ;;  %v860_v34 = vld [vmem:[%s1131_s5 + $0x70] sm:$0xff]  }
  0x23   :  { %193 = vmatprep.mubr.bf16.mxu0 %v864_v1  ;;  %436 = vmatprep.subr.bf16.mxu1 %v824_v35  ;;  %v47_v1 = vld [vmem:[%s1132_s2] sm:$0x3]  ;;  %v861_v35 = vld [vmem:[%s1131_s5 + $0x30] sm:$0xff]  }
  0x24   :  { %746 = vmatpush3.bf16.msra.mxu0 %v849_v52  ;;  %v52_v3 = vrot.slane %v47_v1, %v51_v0  ;;  %v56_v4 = vrot.slane %v47_v1, %v55_v2 }
  0x25   :  { %747 = vmatprep.subr.bf16.mxu0 %v850_v53 }
  0x26   :  { %437 = vmatpush1.bf16.msra.mxu1 %v826_v36  ;;  %v862_v36 = vld [vmem:[%s1131_s5 + $0x78] sm:$0xff]  }
  0x27   :  { %438 = vmatprep.subr.bf16.mxu1 %v827_v37  ;;  %v863_v37 = vld [vmem:[%s1131_s5 + $0x38] sm:$0xff]  }
  0x28   :  { %748 = vmatpush3.bf16.msra.mxu0 %v851_v54 }
  0x29   :  { %749 = vmatprep.subr.bf16.mxu0 %v852_v55 }
  0x2a   :  { %194 = vmatmul.mubr.bf16.gmra.mrb[4].mxu0 %v799_v33  ;;  %439 = vmatpush1.bf16.msra.mxu1 %v829_v38  ;;  %v859_v33 = vld [vmem:[%s1131_s5 + $0x28] sm:$0xff]   ;;  %v248_v38 = vld [vmem:[%s1133_s4] sm:$0x3] }
  0x2b   :  { %440 = vmatprep.subr.bf16.mxu1 %v830_v39  ;;  %v253_v39 = vrot.slane %v248_v38, %v51_v0 }
  0x2c   :  { %750 = vmatpush3.bf16.msra.mxu0 %v853_v56 }
  0x2d   :  { %751 = vmatprep.subr.bf16.mxu0 %v854_v57 }
  0x2e   :  { %441 = vmatpush1.bf16.msra.mxu1 %v832_v40  ;;  %v257_v40 = vrot.slane %v248_v38, %v55_v2 }
  0x2f   :  { %442 = vmatprep.subr.bf16.mxu1 %v833_v41 }
  0x30   :  { %752 = vmatpush3.bf16.msra.mxu0 %v855_v58 }
  0x31   :  { %753 = vmatprep.subr.bf16.mxu0 %v856_v59 }
  0x32   :  { %443 = vmatpush1.bf16.msra.mxu1 %v835_v42 }
  0x33   :  { %444 = vmatprep.subr.bf16.mxu1 %v836_v43 }
  0x34   :  { %754 = vmatpush3.bf16.msra.mxu0 %v857_v60 }
  0x35   :  { %755 = vmatprep.subr.bf16.mxu0 %v858_v61 }
  0x36   :  { %445 = vmatpush1.bf16.msra.mxu1 %v838_v44 }
  0x37   :  { %446 = vmatprep.subr.bf16.mxu1 %v839_v45 }
  0x38   :  { %756 = vmatpush3.bf16.msra.mxu0 %v859_v33 }
  0x39   :  { %757 = vmatprep.subr.bf16.mxu0 %v860_v34 }
  0x3a   :  { %447 = vmatpush1.bf16.msra.mxu1 %v841_v46 }
  0x3b   :  { %448 = vmatprep.subr.bf16.mxu1 %v842_v47 }
  0x3c   :  { %758 = vmatpush3.bf16.msra.mxu0 %v861_v35 }
  0x3d   :  { %759 = vmatprep.subr.bf16.mxu0 %v862_v36 }
  0x3e   :  { %449 = vmatpush1.bf16.msra.mxu1 %v844_v48 }
  0x3f   :  { %450 = vmatprep.subr.bf16.mxu1 %v845_v49 }
  0x40   :  { %760 = vmatpush3.bf16.msra.mxu0 %v863_v37 }
  0x42   :  { %451 = vmatpush1.bf16.msra.mxu1 %v847_v50 }
  0xf5   :  { %v185_v5 = vpop.f32.mrb[0].mxu0 }
  0xf6   :  { %v186_v6 = vadd.f32 %v185_v5, %v52_v3  ;;  %v187_v7 = vpop.f32.mrb[1].mxu0 }
  0xf7   :  { %v188_v8 = vadd.f32 %v187_v7, %v56_v4  ;;  %v189_v9 = vpop.f32.mrb[2].mxu0 }
  0xf8   :  { %v190_v10 = vadd.f32 %v189_v9, %v52_v3  ;;  %v191_v11 = vpop.f32.mrb[3].mxu0  ;;  %v204_v13 = vmax.f32 %v186_v6, 0.0  ;;  %v728_v6 = vld [vmem:[%s1134_s6] ss:$0 sm:$0xff] }
  0xf9   :  { %v192_v12 = vadd.f32 %v191_v11, %v56_v4  ;;  %v205_v15 = vmax.f32 %v188_v8, 0.0 }
  0xfa   :  { %v206_v14 = vmax.f32 %v190_v10, 0.0 }
  0xfb   :  { %v207_v16 = vmax.f32 %v192_v12, 0.0 }
  0xfc   :  { %v212_v17 = vpack.c.bf16 %v206_v14, %v204_v13 }
  0xfd   :  { %v195_v18 = vpop.f32.mrb[4].mxu0  ;;  %v213_v19 = vpack.c.bf16 %v207_v16, %v205_v15 }
  0xfe   :  { %v196_v20 = vadd.f32 %v195_v18, %v52_v3  ;;  %v197_v21 = vpop.f32.mrb[5].mxu0 }
  0xff   :  { %v198_v22 = vadd.f32 %v197_v21, %v56_v4  ;;  %v199_v23 = vpop.f32.mrb[6].mxu0  ;;  %452 = vmatprep.mubr.bf16.mxu1 %v213_v19 }
 0x100   :  { %v200_v24 = vadd.f32 %v199_v23, %v52_v3  ;;  %v201_v25 = vpop.f32.mrb[7].mxu0  ;;  %453 = vmatmul.mubr.bf16.vlgmr.msra.gmra.mrb[0].mxu1 %v212_v17  ;;  %v208_v27 = vmax.f32 %v196_v20, 0.0 }
 0x101   :  { %v202_v26 = vadd.f32 %v201_v25, %v56_v4  ;;  %v209_v29 = vmax.f32 %v198_v22, 0.0 }
 0x102   :  { %v210_v28 = vmax.f32 %v200_v24, 0.0 }
 0x103   :  { %v211_v30 = vmax.f32 %v202_v26, 0.0 }
 0x104   :  { %v214_v31 = vpack.c.bf16 %v210_v28, %v208_v27 }
 0x105   :  { %v215_v32 = vpack.c.bf16 %v211_v30, %v209_v29 }
 0x107   :  { %462 = vmatprep.mubr.bf16.mxu1 %v215_v32 }
 0x108   :  { %463 = vmatmul.mubr.bf16.gmra.mrb[4].mxu1 %v214_v31 }
 0x1d3   :  { %v454_v41 = vpop.f32.mrb[0].mxu1 }
 0x1d4   :  { %v455_v42 = vadd.f32 %v454_v41, %v253_v39  ;;  %v456_v43 = vpop.f32.mrb[1].mxu1 }
 0x1d5   :  { %v457_v44 = vadd.f32 %v456_v43, %v257_v40  ;;  %v458_v45 = vpop.f32.mrb[2].mxu1 }
 0x1d6   :  { %v459_v46 = vadd.f32 %v458_v45, %v253_v39  ;;  %v460_v47 = vpop.f32.mrb[3].mxu1  ;;  %v473_v49 = vmax.f32 %v455_v42, 0.0 }
 0x1d7   :  { %v461_v48 = vadd.f32 %v460_v47, %v257_v40  ;;  %v474_v51 = vmax.f32 %v457_v44, 0.0 }
 0x1d8   :  { %v475_v50 = vmax.f32 %v459_v46, 0.0 }
 0x1d9   :  { %v476_v52 = vmax.f32 %v461_v48, 0.0 }
 0x1da   :  { %v481_v53 = vpack.c.bf16 %v475_v50, %v473_v49 }
 0x1db   :  { %v482_v54 = vpack.c.bf16 %v476_v52, %v474_v51  ;;  %v464_v55 = vpop.f32.mrb[4].mxu1 }
 0x1dc   :  { %v465_v56 = vadd.f32 %v464_v55, %v253_v39  ;;  %v466_v57 = vpop.f32.mrb[5].mxu1 }
 0x1dd   :  { %v467_v58 = vadd.f32 %v466_v57, %v257_v40  ;;  %v468_v59 = vpop.f32.mrb[6].mxu1  ;;  %652 = vmatprep.mubr.bf16.mxu0 %v482_v54 }
 0x1de   :  { %v469_v60 = vadd.f32 %v468_v59, %v253_v39  ;;  %v470_v61 = vpop.f32.mrb[7].mxu1  ;;  %653 = vmatmul.mubr.bf16.vlgmr.msra.gmra.mrb[8].mxu0 %v481_v53  ;;  %v477_v63 = vmax.f32 %v465_v56, 0.0 }
 0x1df   :  { %v471_v62 = vadd.f32 %v470_v61, %v257_v40  ;;  %v478_v1 = vmax.f32 %v467_v58, 0.0 }
 0x1e0   :  { %v479_v0 = vmax.f32 %v469_v60, 0.0 }
 0x1e1   :  { %v480_v2 = vmax.f32 %v471_v62, 0.0 }
 0x1e2   :  { %v483_v3 = vpack.c.bf16 %v479_v0, %v477_v63 }
 0x1e3   :  { %v484_v4 = vpack.c.bf16 %v480_v2, %v478_v1 }
 0x1e5   :  { %660 = vmatprep.mubr.bf16.mxu0 %v484_v4 }
 0x1e6   :  { %661 = vmatmul.mubr.bf16.gmra.mrb[12].mxu0 %v483_v3 }
 0x2b1   :  { %v761_v5 = vpop.f32.mrb[8].mxu0 }
 0x2b2   :  { %v762_v7 = vpop.f32.mrb[9].mxu0 }
 0x2b3   :  { %v763_v8 = vadd.f32 %v762_v7, %v761_v5  ;;  %v764_v9 = vpop.f32.mrb[10].mxu0 }
 0x2b4   :  { %v765_v10 = vpop.f32.mrb[11].mxu0 }
 0x2b5   :  { %v655_v11 = vadd.f32 %v763_v8, %v728_v6  ;;  %v766_v12 = vadd.f32 %v765_v10, %v764_v9 }
 0x2b7   :  { %670 = vst.msk [vmem:[%s1135_s7] sm:$0xff] %vm669_vm0, %v655_v11  ;;  %v658_v13 = vadd.f32 %v766_v12, %v728_v6 }
 0x2b9   :  { %671 = vst.msk [vmem:[%s1135_s7 + $0x8] sm:$0xff] %vm669_vm0, %v658_v13  ;;  %v767_v14 = vpop.f32.mrb[12].mxu0 }
 0x2ba   :  { %v768_v15 = vpop.f32.mrb[13].mxu0 }
 0x2bb   :  { %v769_v16 = vadd.f32 %v768_v15, %v767_v14  ;;  %v770_v17 = vpop.f32.mrb[14].mxu0 }
 0x2bc   :  { %v771_v18 = vpop.f32.mrb[15].mxu0 }
 0x2bd   :  { %v663_v19 = vadd.f32 %v769_v16, %v728_v6  ;;  %v772_v20 = vadd.f32 %v771_v18, %v770_v17 }
 0x2bf   :  { %672 = vst.msk [vmem:[%s1135_s7 + $0x10] sm:$0xff] %vm669_vm0, %v663_v19  ;;  %v666_v21 = vadd.f32 %v772_v20, %v728_v6 }
 0x2c1   :  { %673 = vst.msk [vmem:[%s1135_s7 + $0x18] sm:$0xff] %vm669_vm0, %v666_v21 }

</bundles_post_ra>
